<compile_context>
chip_gen: v6e
topology: v6e:2x2x1
jax: 0.10.0
libtpu: 0.0.40
codegen_flags: <defaults>
</compile_context>

<pallas_src>
import functools

import numpy as np
import jax
import jax.numpy as jnp
from jax import lax
from jax.experimental import pallas as pl
from jax.experimental.pallas import tpu as pltpu

_CDT = jnp.bfloat16          # MXU operand dtype (accumulation stays f32)


# ----------------------------------------------------------------------------
# Block-Toeplitz conv weights: conv along W becomes part of the matmul.
#   A[kh, wi*Cin+ci, wo*Cout+co] = W[kh, kw, ci, co]  where kw = wi - wo*s + pad
# (W-padding folded in as zero entries; only H-padding remains for the kernel.)
# ----------------------------------------------------------------------------
def _toeplitz_weights(w_hwio, w_in, w_out, stride, pad):
    K, Kw, Cin, Cout = w_hwio.shape
    sel = np.zeros((Kw, w_in, w_out), np.float32)
    for kw in range(Kw):
        for wo in range(w_out):
            wi = wo * stride + kw - pad
            if 0 <= wi < w_in:
                sel[kw, wi, wo] = 1.0
    a = jnp.einsum("hwio,wxy->hxiyo", w_hwio.astype(jnp.float32),
                   jnp.asarray(sel))                       # (K, w_in, Cin, w_out, Cout)
    return a.reshape(K, w_in * Cin, w_out * Cout)


def _lane_bias(b, w_out):
    return jnp.tile(b.astype(jnp.float32), w_out)[None, :]   # (1, w_out*Cout), f32


# ----------------------------------------------------------------------------
# Fused Pallas kernel: Nb batch elements per grid step, everything in VMEM.
# ----------------------------------------------------------------------------
def _make_fused_kernel(*, K, stride, H, W, Cin, Ho, Wo, Cout, pad, has_ds, Nb):
    WCin = W * Cin
    WoC = Wo * Cout
    M = Nb * Ho                      # MXU M dimension for every dot

    def _slab(src_ref, start):
        # (Nb, Ho, lanes) slab of rows start, start+stride, ... — read straight
        # from the VMEM ref so the row shift happens in the load (no relayout
        # of a loaded array).
        if stride == 1:
            return src_ref[:, start:start + Ho, :]
        # TODO(synk): for stride=2 at real shapes, deinterleave even/odd rows
        # once per step instead of K strided slices.
        v = src_ref[...]
        return lax.slice(v, (0, start, 0),
                         (v.shape[0], start + (Ho - 1) * stride + 1, v.shape[2]),
                         (1, stride, 1))

    def kernel(x_ref, a1_ref, b1_ref, a2_ref, b2_ref, *rest):
        if has_ds:
            ad_ref, bd_ref, o_ref, xp_s, y1p_s = rest
        else:
            o_ref, xp_s, y1p_s = rest

        x = x_ref[...]                                     # (Nb, H, W*Cin) f32

        # ---- stage x (bf16) into the H-padded scratch; zero ONLY the pad rows.
        zx = jnp.zeros((Nb, pad, WCin), _CDT)
        xp_s[:, 0:pad, :] = zx
        xp_s[:, pad + H:pad + H + pad, :] = zx
        xp_s[:, pad:pad + H, :] = x.astype(_CDT)

        # ---- conv1 + BN1 + ReLU: K row-shifted MXU matmuls (bf16 in, f32 acc),
        #      accumulator initialized with the kh=0 dot + bias (no zeros).
        acc = jnp.dot(_slab(xp_s, 0).reshape(M, WCin), a1_ref[0],
                      preferred_element_type=jnp.float32) + b1_ref[...]
        for kh in range(1, K):
            acc = acc + jnp.dot(_slab(xp_s, kh).reshape(M, WCin), a1_ref[kh],
                                preferred_element_type=jnp.float32)
        y1 = jnp.maximum(acc, 0.0)                         # (M, Wo*Cout) f32, in VMEM

        # ---- identity path: 1x1 conv + BNd if shape changes, else f32 pass-through.
        if has_ds:
            if stride == 1:
                xd = x
            else:
                xd = lax.slice(x, (0, 0, 0),
                               (Nb, (Ho - 1) * stride + 1, WCin), (1, stride, 1))
            acc2 = jnp.dot(xd.astype(_CDT).reshape(M, WCin), ad_ref[0],
                           preferred_element_type=jnp.float32) + bd_ref[...]
        else:
            acc2 = x.reshape(M, WoC)                        # (H,WCin) == (Ho,WoC) here

        # ---- conv2 + BN2 accumulated on top of the identity, then ReLU.
        zy = jnp.zeros((Nb, 1, WoC), _CDT)
        y1p_s[:, 0:1, :] = zy
        y1p_s[:, 1 + Ho:2 + Ho, :] = zy
        y1p_s[:, 1:1 + Ho, :] = y1.reshape(Nb, Ho, WoC).astype(_CDT)

        acc2 = acc2 + b2_ref[...]
        for kh in range(K):                                 # conv2 is always stride 1
            acc2 = acc2 + jnp.dot(y1p_s[:, kh:kh + Ho, :].reshape(M, WoC),
                                  a2_ref[kh],
                                  preferred_element_type=jnp.float32)
        out = jnp.maximum(acc2, 0.0)

        o_ref[...] = out.reshape(Nb, Ho, WoC).astype(o_ref.dtype)   # lane-dense store

    return kernel


def fused_block_nhwc(x, prep, *, stride=1):
    """x: (N,H,W,Cin) NHWC. prep: prepared (BN-folded, Toeplitz, bf16) weights.
    Returns (N,Ho,Wo,Cout)."""
    N, H, W, Cin = x.shape
    a1, b1, a2, b2 = prep["a1"], prep["b1"], prep["a2"], prep["b2"]
    has_ds = "ad" in prep
    K = a1.shape[0]
    pad = 1
    Ho = (H + 2 * pad - K) // stride + 1
    Wo = (W + 2 * pad - K) // stride + 1
    Cout = a1.shape[2] // Wo
    WCin, WoC = W * Cin, Wo * Cout

    # Batch tile: raise the MXU M dimension (M = Nb*Ho) and amortize grid-step
    # overhead.  Largest divisor of N with Nb*Ho <= ~256.
    nb_cap = max(1, 256 // max(Ho, 1))
    Nb = 1
    for d in range(1, N + 1):
        if N % d == 0 and d <= nb_cap:
            Nb = d

    x2 = x.reshape(N, H, WCin)                  # free view: (w, ci) lane-flat

    inputs = [x2, a1, b1, a2, b2]
    in_specs = [
        pl.BlockSpec((Nb, H, WCin), lambda n: (n, 0, 0)),
        # Grid-invariant weights (constant index_map).  TODO(synk): at real
        # shapes single-buffer these (pipeline_mode=pl.Buffered(1)) and band/
        # lane-tile a2 so it fits v7x's 64 MiB VMEM.
        pl.BlockSpec((K, WCin, WoC), lambda n: (0, 0, 0)),
        pl.BlockSpec((1, WoC), lambda n: (0, 0)),
        pl.BlockSpec((K, WoC, WoC), lambda n: (0, 0, 0)),
        pl.BlockSpec((1, WoC), lambda n: (0, 0)),
    ]
    if has_ds:
        inputs += [prep["ad"], prep["bd"]]
        in_specs += [
            pl.BlockSpec((1, WCin, WoC), lambda n: (0, 0, 0)),
            pl.BlockSpec((1, WoC), lambda n: (0, 0)),
        ]

    kernel = _make_fused_kernel(K=K, stride=stride, H=H, W=W, Cin=Cin,
                                Ho=Ho, Wo=Wo, Cout=Cout, pad=pad,
                                has_ds=has_ds, Nb=Nb)

    out = pl.pallas_call(
        kernel,
        out_shape=jax.ShapeDtypeStruct((N, Ho, WoC), x.dtype),
        grid=(N // Nb,),
        in_specs=in_specs,
        out_specs=pl.BlockSpec((Nb, Ho, WoC), lambda n: (n, 0, 0)),
        scratch_shapes=[
            pltpu.VMEM((Nb, H + 2 * pad, WCin), _CDT),   # H-padded x (bf16)
            pltpu.VMEM((Nb, Ho + 2, WoC), _CDT),         # H-padded y1 (bf16)
        ],
        # VMEM footprint here is <1 MiB; at realistic ResNet shapes add Ho row
        # tiles + Wo*Cout lane tiles and set vmem_limit_bytes for v7x (64 MiB).
        compiler_params=pltpu.CompilerParams(
            dimension_semantics=("parallel",)),
    )(*inputs)
    return out.reshape(N, Ho, Wo, Cout)


# ----------------------------------------------------------------------------
# Parameter setup / BN folding / Toeplitz prep (plain JAX glue, done ONCE)
# ----------------------------------------------------------------------------
def fold_bn(w, b, bn, eps=1e-5):
    """Fold eval-mode BatchNorm2d into conv weight (HWIO) and bias."""
    gamma, beta, mean, var = bn
    scale = gamma / jnp.sqrt(var + eps)
    return w * scale[None, None, None, :], (b - mean) * scale + beta


def prepare_block_params(params, *, W, stride=1):
    """Fold BN and build bf16 block-Toeplitz MXU weights once, at weight-fold
    time (not inside the jitted forward)."""
    pad = 1
    K = params["w1"].shape[0]
    Wo = (W + 2 * pad - K) // stride + 1
    w1f, b1f = fold_bn(params["w1"], params["b1"], params["bn1"])
    w2f, b2f = fold_bn(params["w2"], params["b2"], params["bn2"])
    prep = {
        "a1": _toeplitz_weights(w1f, W, Wo, stride, pad).astype(_CDT),
        "b1": _lane_bias(b1f, Wo),
        "a2": _toeplitz_weights(w2f, Wo, Wo, 1, pad).astype(_CDT),
        "b2": _lane_bias(b2f, Wo),
    }
    if "wd" in params:
        wdf, bdf = fold_bn(params["wd"], params["bd"], params["bnd"])
        prep["ad"] = _toeplitz_weights(wdf, W, Wo, stride, 0).astype(_CDT)
        prep["bd"] = _lane_bias(bdf, Wo)
    return prep


def init_params(key, cin, cout, stride):
    ks = jax.random.split(key, 12)

    def conv_w(k, kh, kw, ci, co):
        return jax.random.normal(k, (kh, kw, ci, co), jnp.float32) * 0.1

    def bn_params(k):
        k1, k2, k3, k4 = jax.random.split(k, 4)
        gamma = 1.0 + 0.1 * jax.random.normal(k1, (cout,), jnp.float32)
        beta = 0.1 * jax.random.normal(k2, (cout,), jnp.float32)
        mean = 0.1 * jax.random.normal(k3, (cout,), jnp.float32)
        var = jax.random.uniform(k4, (cout,), jnp.float32, 0.5, 1.5)
        return (gamma, beta, mean, var)

    params = {
        "w1": conv_w(ks[0], 3, 3, cin, cout),
        "b1": 0.1 * jax.random.normal(ks[1], (cout,), jnp.float32),
        "bn1": bn_params(ks[2]),
        "w2": conv_w(ks[3], 3, 3, cout, cout),
        "b2": 0.1 * jax.random.normal(ks[4], (cout,), jnp.float32),
        "bn2": bn_params(ks[5]),
    }
    if not (stride == 1 and cin == cout):
        params["wd"] = conv_w(ks[6], 1, 1, cin, cout)
        params["bd"] = 0.1 * jax.random.normal(ks[7], (cout,), jnp.float32)
        params["bnd"] = bn_params(ks[8])
    return params


def basic_res_block(x_nchw, prep, *, stride=1):
    """BasicResBlock forward. Input/output NCHW (PyTorch convention); the
    NCHW<->NHWC transposes are boundary-only and vanish if the surrounding
    model stays NHWC."""
    x = jnp.transpose(x_nchw, (0, 2, 3, 1))
    out = fused_block_nhwc(x, prep, stride=stride)
    return jnp.transpose(out, (0, 3, 1, 2))


# ----------------------------------------------------------------------------
# Pure-JAX reference (same folded weights, same bf16-operand / f32-acc policy)
# ----------------------------------------------------------------------------
def _ref_conv(x, w, b, stride, pad):
    y = lax.conv_general_dilated(
        x.astype(_CDT), w.astype(_CDT),
        window_strides=(stride, stride), padding=((pad, pad), (pad, pad)),
        dimension_numbers=("NHWC", "HWIO", "NHWC"),
        preferred_element_type=jnp.float32)
    return y + b[None, None, None, :]


def basic_res_block_ref(x_nchw, params, *, stride=1):
    x = jnp.transpose(x_nchw, (0, 2, 3, 1))
    w1f, b1f = fold_bn(params["w1"], params["b1"], params["bn1"])
    w2f, b2f = fold_bn(params["w2"], params["b2"], params["bn2"])
    y1 = jnp.maximum(_ref_conv(x, w1f, b1f, stride, 1), 0.0)
    y2 = _ref_conv(y1, w2f, b2f, 1, 1)
    if "wd" in params:
        wdf, bdf = fold_bn(params["wd"], params["bd"], params["bnd"])
        identity = _ref_conv(x, wdf, bdf, stride, 0)
    else:
        identity = x
    out = jnp.maximum(y2 + identity, 0.0)
    return jnp.transpose(out, (0, 3, 1, 2))


# ----------------------------------------------------------------------------
if __name__ == "__main__":
    key = jax.random.PRNGKey(0)
    k_x, k_p = jax.random.split(key)

    N, Cin, Cout, H, W = 2, 4, 8, 16, 16
    stride = 1                                  # Cin != Cout -> downsample path exists

    x = jax.random.normal(k_x, (N, Cin, H, W), jnp.float32)   # NCHW like PyTorch
    params = init_params(k_p, Cin, Cout, stride)

    # Weight-fold-time prep (BN fold + Toeplitz + bf16), done once, not per call.
    prep = prepare_block_params(params, W=W, stride=stride)

    fwd = jax.jit(functools.partial(basic_res_block, stride=stride))
    out = jax.block_until_ready(fwd(x, prep))

    ref = basic_res_block_ref(x, params, stride=stride)
    assert out.shape == (N, Cout, H // stride, W // stride), out.shape
    err = float(jnp.max(jnp.abs(out - ref)))
    assert jnp.allclose(out, ref, atol=2e-2, rtol=2e-2), f"mismatch vs reference: {err}"

    print("KERNEL_OK")
</pallas_src>

<mosaic_0001>
module attributes {stable_mosaic.version = 11 : i64} {
  func.func @kernel(%arg0: i32, %arg1: memref<2x16x64xf32, #tpu.memory_space<vmem>>, %arg2: memref<3x64x128xbf16, #tpu.memory_space<vmem>>, %arg3: memref<1x128xf32, #tpu.memory_space<vmem>>, %arg4: memref<3x128x128xbf16, #tpu.memory_space<vmem>>, %arg5: memref<1x128xf32, #tpu.memory_space<vmem>>, %arg6: memref<1x64x128xbf16, #tpu.memory_space<vmem>>, %arg7: memref<1x128xf32, #tpu.memory_space<vmem>>, %arg8: memref<2x16x128xf32, #tpu.memory_space<vmem>>, %arg9: memref<2x18x64xbf16, #tpu.memory_space<vmem>>, %arg10: memref<2x18x128xbf16, #tpu.memory_space<vmem>>) attributes {dimension_semantics = [#tpu.dimension_semantics<parallel>], iteration_bounds = array<i64: 1>, scalar_prefetch = 0 : i64, scratch_operands = 2 : i64, tpu.core_type = #tpu.core_type<tc>, window_params = [{transform_indices = @transform_0, window_bounds = array<i64: 2, 16, 64>}, {pipeline_mode = #tpu.pipeline_mode<synchronous>, transform_indices = @transform_1, window_bounds = array<i64: 3, 64, 128>}, {pipeline_mode = #tpu.pipeline_mode<synchronous>, transform_indices = @transform_2, window_bounds = array<i64: 1, 128>}, {pipeline_mode = #tpu.pipeline_mode<synchronous>, transform_indices = @transform_3, window_bounds = array<i64: 3, 128, 128>}, {pipeline_mode = #tpu.pipeline_mode<synchronous>, transform_indices = @transform_4, window_bounds = array<i64: 1, 128>}, {pipeline_mode = #tpu.pipeline_mode<synchronous>, transform_indices = @transform_5, window_bounds = array<i64: 1, 64, 128>}, {pipeline_mode = #tpu.pipeline_mode<synchronous>, transform_indices = @transform_6, window_bounds = array<i64: 1, 128>}, {transform_indices = @transform_7, window_bounds = array<i64: 2, 16, 128>}]} {
    %c0 = arith.constant 0 : index
    %c0_0 = arith.constant 0 : index
    %c0_1 = arith.constant 0 : index
    %0 = vector.load %arg1[%c0, %c0_0, %c0_1] : memref<2x16x64xf32, #tpu.memory_space<vmem>>, vector<2x16x64xf32>
    %cst = arith.constant 0.000000e+00 : bf16
    %1 = vector.broadcast %cst : bf16 to vector<2x1x64xbf16>
    %c0_2 = arith.constant 0 : index
    %c0_3 = arith.constant 0 : index
    %c0_4 = arith.constant 0 : index
    %2 = vector.load %arg9[%c0_2, %c0_3, %c0_4] : memref<2x18x64xbf16, #tpu.memory_space<vmem>>, vector<2x1x64xbf16>
    tpu.vector_store %arg9[%c0_2, %c0_3, %c0_4], %1 {strides = array<i32>} : memref<2x18x64xbf16, #tpu.memory_space<vmem>>, vector<2x1x64xbf16>,
    %c0_5 = arith.constant 0 : index
    %c17 = arith.constant 17 : index
    %c0_6 = arith.constant 0 : index
    %3 = vector.load %arg9[%c0_5, %c17, %c0_6] : memref<2x18x64xbf16, #tpu.memory_space<vmem>>, vector<2x1x64xbf16>
    tpu.vector_store %arg9[%c0_5, %c17, %c0_6], %1 {strides = array<i32>} : memref<2x18x64xbf16, #tpu.memory_space<vmem>>, vector<2x1x64xbf16>,
    %4 = arith.truncf %0 : vector<2x16x64xf32> to vector<2x16x64xbf16>
    %c0_7 = arith.constant 0 : index
    %c1 = arith.constant 1 : index
    %c0_8 = arith.constant 0 : index
    %5 = vector.load %arg9[%c0_7, %c1, %c0_8] : memref<2x18x64xbf16, #tpu.memory_space<vmem>>, vector<2x16x64xbf16>
    tpu.vector_store %arg9[%c0_7, %c1, %c0_8], %4 {strides = array<i32>} : memref<2x18x64xbf16, #tpu.memory_space<vmem>>, vector<2x16x64xbf16>,
    %c0_9 = arith.constant 0 : index
    %c0_10 = arith.constant 0 : index
    %c0_11 = arith.constant 0 : index
    %6 = vector.load %arg9[%c0_9, %c0_10, %c0_11] : memref<2x18x64xbf16, #tpu.memory_space<vmem>>, vector<2x16x64xbf16>
    %7 = vector.shape_cast %6 : vector<2x16x64xbf16> to vector<32x64xbf16>
    %c0_12 = arith.constant 0 : index
    %c0_13 = arith.constant 0 : index
    %c0_14 = arith.constant 0 : index
    %8 = vector.load %arg2[%c0_12, %c0_13, %c0_14] : memref<3x64x128xbf16, #tpu.memory_space<vmem>>, vector<1x64x128xbf16>
    %9 = vector.shape_cast %8 : vector<1x64x128xbf16> to vector<64x128xbf16>
    %cst_15 = arith.constant dense<0.000000e+00> : vector<32x128xf32>
    %10 = tpu.matmul %7, %9, %cst_15 {dimension_numbers = #tpu.dot_dimension_numbers<[1], [0], [0], [1], [0, 0, 1, 1], [], []>} : vector<32x64xbf16>, vector<64x128xbf16>, vector<32x128xf32> -> vector<32x128xf32>
    %c0_16 = arith.constant 0 : index
    %c0_17 = arith.constant 0 : index
    %11 = vector.load %arg3[%c0_16, %c0_17] : memref<1x128xf32, #tpu.memory_space<vmem>>, vector<1x128xf32>
    %12 = vector.broadcast %11 : vector<1x128xf32> to vector<32x128xf32>
    %13 = arith.addf %10, %12 : vector<32x128xf32>
    %c0_18 = arith.constant 0 : index
    %c1_19 = arith.constant 1 : index
    %c0_20 = arith.constant 0 : index
    %14 = vector.load %arg9[%c0_18, %c1_19, %c0_20] : memref<2x18x64xbf16, #tpu.memory_space<vmem>>, vector<2x16x64xbf16>
    %15 = vector.shape_cast %14 : vector<2x16x64xbf16> to vector<32x64xbf16>
    %c1_21 = arith.constant 1 : index
    %c0_22 = arith.constant 0 : index
    %c0_23 = arith.constant 0 : index
    %16 = vector.load %arg2[%c1_21, %c0_22, %c0_23] : memref<3x64x128xbf16, #tpu.memory_space<vmem>>, vector<1x64x128xbf16>
    %17 = vector.shape_cast %16 : vector<1x64x128xbf16> to vector<64x128xbf16>
    %cst_24 = arith.constant dense<0.000000e+00> : vector<32x128xf32>
    %18 = tpu.matmul %15, %17, %cst_24 {dimension_numbers = #tpu.dot_dimension_numbers<[1], [0], [0], [1], [0, 0, 1, 1], [], []>} : vector<32x64xbf16>, vector<64x128xbf16>, vector<32x128xf32> -> vector<32x128xf32>
    %19 = arith.addf %13, %18 : vector<32x128xf32>
    %c0_25 = arith.constant 0 : index
    %c2 = arith.constant 2 : index
    %c0_26 = arith.constant 0 : index
    %20 = vector.load %arg9[%c0_25, %c2, %c0_26] : memref<2x18x64xbf16, #tpu.memory_space<vmem>>, vector<2x16x64xbf16>
    %21 = vector.shape_cast %20 : vector<2x16x64xbf16> to vector<32x64xbf16>
    %c2_27 = arith.constant 2 : index
    %c0_28 = arith.constant 0 : index
    %c0_29 = arith.constant 0 : index
    %22 = vector.load %arg2[%c2_27, %c0_28, %c0_29] : memref<3x64x128xbf16, #tpu.memory_space<vmem>>, vector<1x64x128xbf16>
    %23 = vector.shape_cast %22 : vector<1x64x128xbf16> to vector<64x128xbf16>
    %cst_30 = arith.constant dense<0.000000e+00> : vector<32x128xf32>
    %24 = tpu.matmul %21, %23, %cst_30 {dimension_numbers = #tpu.dot_dimension_numbers<[1], [0], [0], [1], [0, 0, 1, 1], [], []>} : vector<32x64xbf16>, vector<64x128xbf16>, vector<32x128xf32> -> vector<32x128xf32>
    %25 = arith.addf %19, %24 : vector<32x128xf32>
    %cst_31 = arith.constant 0.000000e+00 : f32
    %26 = vector.broadcast %cst_31 : f32 to vector<32x128xf32>
    %27 = arith.maximumf %25, %26 : vector<32x128xf32>
    %28 = arith.truncf %0 : vector<2x16x64xf32> to vector<2x16x64xbf16>
    %29 = vector.shape_cast %28 : vector<2x16x64xbf16> to vector<32x64xbf16>
    %c0_32 = arith.constant 0 : index
    %c0_33 = arith.constant 0 : index
    %c0_34 = arith.constant 0 : index
    %30 = vector.load %arg6[%c0_32, %c0_33, %c0_34] : memref<1x64x128xbf16, #tpu.memory_space<vmem>>, vector<1x64x128xbf16>
    %31 = vector.shape_cast %30 : vector<1x64x128xbf16> to vector<64x128xbf16>
    %cst_35 = arith.constant dense<0.000000e+00> : vector<32x128xf32>
    %32 = tpu.matmul %29, %31, %cst_35 {dimension_numbers = #tpu.dot_dimension_numbers<[1], [0], [0], [1], [0, 0, 1, 1], [], []>} : vector<32x64xbf16>, vector<64x128xbf16>, vector<32x128xf32> -> vector<32x128xf32>
    %c0_36 = arith.constant 0 : index
    %c0_37 = arith.constant 0 : index
    %33 = vector.load %arg7[%c0_36, %c0_37] : memref<1x128xf32, #tpu.memory_space<vmem>>, vector<1x128xf32>
    %34 = vector.broadcast %33 : vector<1x128xf32> to vector<32x128xf32>
    %35 = arith.addf %32, %34 : vector<32x128xf32>
    %cst_38 = arith.constant 0.000000e+00 : bf16
    %36 = vector.broadcast %cst_38 : bf16 to vector<2x1x128xbf16>
    %c0_39 = arith.constant 0 : index
    %c0_40 = arith.constant 0 : index
    %c0_41 = arith.constant 0 : index
    %37 = vector.load %arg10[%c0_39, %c0_40, %c0_41] : memref<2x18x128xbf16, #tpu.memory_space<vmem>>, vector<2x1x128xbf16>
    tpu.vector_store %arg10[%c0_39, %c0_40, %c0_41], %36 {strides = array<i32>} : memref<2x18x128xbf16, #tpu.memory_space<vmem>>, vector<2x1x128xbf16>,
    %c0_42 = arith.constant 0 : index
    %c17_43 = arith.constant 17 : index
    %c0_44 = arith.constant 0 : index
    %38 = vector.load %arg10[%c0_42, %c17_43, %c0_44] : memref<2x18x128xbf16, #tpu.memory_space<vmem>>, vector<2x1x128xbf16>
    tpu.vector_store %arg10[%c0_42, %c17_43, %c0_44], %36 {strides = array<i32>} : memref<2x18x128xbf16, #tpu.memory_space<vmem>>, vector<2x1x128xbf16>,
    %39 = vector.shape_cast %27 : vector<32x128xf32> to vector<2x16x128xf32>
    %40 = arith.truncf %39 : vector<2x16x128xf32> to vector<2x16x128xbf16>
    %c0_45 = arith.constant 0 : index
    %c1_46 = arith.constant 1 : index
    %c0_47 = arith.constant 0 : index
    %41 = vector.load %arg10[%c0_45, %c1_46, %c0_47] : memref<2x18x128xbf16, #tpu.memory_space<vmem>>, vector<2x16x128xbf16>
    tpu.vector_store %arg10[%c0_45, %c1_46, %c0_47], %40 {strides = array<i32>} : memref<2x18x128xbf16, #tpu.memory_space<vmem>>, vector<2x16x128xbf16>,
    %c0_48 = arith.constant 0 : index
    %c0_49 = arith.constant 0 : index
    %42 = vector.load %arg5[%c0_48, %c0_49] : memref<1x128xf32, #tpu.memory_space<vmem>>, vector<1x128xf32>
    %43 = vector.broadcast %42 : vector<1x128xf32> to vector<32x128xf32>
    %44 = arith.addf %35, %43 : vector<32x128xf32>
    %c0_50 = arith.constant 0 : index
    %c0_51 = arith.constant 0 : index
    %c0_52 = arith.constant 0 : index
    %45 = vector.load %arg10[%c0_50, %c0_51, %c0_52] : memref<2x18x128xbf16, #tpu.memory_space<vmem>>, vector<2x16x128xbf16>
    %46 = vector.shape_cast %45 : vector<2x16x128xbf16> to vector<32x128xbf16>
    %c0_53 = arith.constant 0 : index
    %c0_54 = arith.constant 0 : index
    %c0_55 = arith.constant 0 : index
    %47 = vector.load %arg4[%c0_53, %c0_54, %c0_55] : memref<3x128x128xbf16, #tpu.memory_space<vmem>>, vector<1x128x128xbf16>
    %48 = vector.shape_cast %47 : vector<1x128x128xbf16> to vector<128x128xbf16>
    %cst_56 = arith.constant dense<0.000000e+00> : vector<32x128xf32>
    %49 = tpu.matmul %46, %48, %cst_56 {dimension_numbers = #tpu.dot_dimension_numbers<[1], [0], [0], [1], [0, 0, 1, 1], [], []>} : vector<32x128xbf16>, vector<128x128xbf16>, vector<32x128xf32> -> vector<32x128xf32>
    %50 = arith.addf %44, %49 : vector<32x128xf32>
    %c0_57 = arith.constant 0 : index
    %c1_58 = arith.constant 1 : index
    %c0_59 = arith.constant 0 : index
    %51 = vector.load %arg10[%c0_57, %c1_58, %c0_59] : memref<2x18x128xbf16, #tpu.memory_space<vmem>>, vector<2x16x128xbf16>
    %52 = vector.shape_cast %51 : vector<2x16x128xbf16> to vector<32x128xbf16>
    %c1_60 = arith.constant 1 : index
    %c0_61 = arith.constant 0 : index
    %c0_62 = arith.constant 0 : index
    %53 = vector.load %arg4[%c1_60, %c0_61, %c0_62] : memref<3x128x128xbf16, #tpu.memory_space<vmem>>, vector<1x128x128xbf16>
    %54 = vector.shape_cast %53 : vector<1x128x128xbf16> to vector<128x128xbf16>
    %cst_63 = arith.constant dense<0.000000e+00> : vector<32x128xf32>
    %55 = tpu.matmul %52, %54, %cst_63 {dimension_numbers = #tpu.dot_dimension_numbers<[1], [0], [0], [1], [0, 0, 1, 1], [], []>} : vector<32x128xbf16>, vector<128x128xbf16>, vector<32x128xf32> -> vector<32x128xf32>
    %56 = arith.addf %50, %55 : vector<32x128xf32>
    %c0_64 = arith.constant 0 : index
    %c2_65 = arith.constant 2 : index
    %c0_66 = arith.constant 0 : index
    %57 = vector.load %arg10[%c0_64, %c2_65, %c0_66] : memref<2x18x128xbf16, #tpu.memory_space<vmem>>, vector<2x16x128xbf16>
    %58 = vector.shape_cast %57 : vector<2x16x128xbf16> to vector<32x128xbf16>
    %c2_67 = arith.constant 2 : index
    %c0_68 = arith.constant 0 : index
    %c0_69 = arith.constant 0 : index
    %59 = vector.load %arg4[%c2_67, %c0_68, %c0_69] : memref<3x128x128xbf16, #tpu.memory_space<vmem>>, vector<1x128x128xbf16>
    %60 = vector.shape_cast %59 : vector<1x128x128xbf16> to vector<128x128xbf16>
    %cst_70 = arith.constant dense<0.000000e+00> : vector<32x128xf32>
    %61 = tpu.matmul %58, %60, %cst_70 {dimension_numbers = #tpu.dot_dimension_numbers<[1], [0], [0], [1], [0, 0, 1, 1], [], []>} : vector<32x128xbf16>, vector<128x128xbf16>, vector<32x128xf32> -> vector<32x128xf32>
    %62 = arith.addf %56, %61 : vector<32x128xf32>
    %cst_71 = arith.constant 0.000000e+00 : f32
    %63 = vector.broadcast %cst_71 : f32 to vector<32x128xf32>
    %64 = arith.maximumf %62, %63 : vector<32x128xf32>
    %65 = vector.shape_cast %64 : vector<32x128xf32> to vector<2x16x128xf32>
    %c0_72 = arith.constant 0 : index
    %c0_73 = arith.constant 0 : index
    %c0_74 = arith.constant 0 : index
    %66 = vector.load %arg8[%c0_72, %c0_73, %c0_74] : memref<2x16x128xf32, #tpu.memory_space<vmem>>, vector<2x16x128xf32>
    tpu.vector_store %arg8[%c0_72, %c0_73, %c0_74], %65 {strides = array<i32>} : memref<2x16x128xf32, #tpu.memory_space<vmem>>, vector<2x16x128xf32>,
    return
  }
  func.func @transform_0(%arg0: i32) -> (i32, i32, i32) {
    %c0_i32 = arith.constant 0 : i32
    %c0_i32_0 = arith.constant 0 : i32
    %c0_i32_1 = arith.constant 0 : i32
    return %arg0, %c0_i32, %c0_i32_0 : i32, i32, i32
  }
  func.func @transform_1(%arg0: i32) -> (i32, i32, i32) {
    %c0_i32 = arith.constant 0 : i32
    %c0_i32_0 = arith.constant 0 : i32
    %c0_i32_1 = arith.constant 0 : i32
    %c0_i32_2 = arith.constant 0 : i32
    return %c0_i32, %c0_i32_0, %c0_i32_1 : i32, i32, i32
  }
  func.func @transform_2(%arg0: i32) -> (i32, i32) {
    %c0_i32 = arith.constant 0 : i32
    %c0_i32_0 = arith.constant 0 : i32
    %c0_i32_1 = arith.constant 0 : i32
    return %c0_i32, %c0_i32_0 : i32, i32
  }
  func.func @transform_3(%arg0: i32) -> (i32, i32, i32) {
    %c0_i32 = arith.constant 0 : i32
    %c0_i32_0 = arith.constant 0 : i32
    %c0_i32_1 = arith.constant 0 : i32
    %c0_i32_2 = arith.constant 0 : i32
    return %c0_i32, %c0_i32_0, %c0_i32_1 : i32, i32, i32
  }
  func.func @transform_4(%arg0: i32) -> (i32, i32) {
    %c0_i32 = arith.constant 0 : i32
    %c0_i32_0 = arith.constant 0 : i32
    %c0_i32_1 = arith.constant 0 : i32
    return %c0_i32, %c0_i32_0 : i32, i32
  }
  func.func @transform_5(%arg0: i32) -> (i32, i32, i32) {
    %c0_i32 = arith.constant 0 : i32
    %c0_i32_0 = arith.constant 0 : i32
    %c0_i32_1 = arith.constant 0 : i32
    %c0_i32_2 = arith.constant 0 : i32
    return %c0_i32, %c0_i32_0, %c0_i32_1 : i32, i32, i32
  }
  func.func @transform_6(%arg0: i32) -> (i32, i32) {
    %c0_i32 = arith.constant 0 : i32
    %c0_i32_0 = arith.constant 0 : i32
    %c0_i32_1 = arith.constant 0 : i32
    return %c0_i32, %c0_i32_0 : i32, i32
  }
  func.func @transform_7(%arg0: i32) -> (i32, i32, i32) {
    %c0_i32 = arith.constant 0 : i32
    %c0_i32_0 = arith.constant 0 : i32
    %c0_i32_1 = arith.constant 0 : i32
    return %arg0, %c0_i32, %c0_i32_0 : i32, i32, i32
  }
}

</mosaic_0001>

<bundles_post_ra>
// kernel: basic_res_block.1
= control target key start
LH: loop header
LB: loop body
LE: loop exit
PB: predicated region body
PF: predicated region fallthrough
CT: control target
= control target key end

     0   :  { %vm32_vm0 = vsmask.f32 256  ;;  %v34_v2 = vld [vmem:[#allocation2] sm:$0x1]  ;;  %vm31_vm1 = vcmask 516096   ;;  %vm102_vm6 = vcmask 519168   ;;  %s1865_s1 = inlined_call_operand.vmem [shape: bf16[3,64,128], index: 1, kind: input, shape index: {}]   ;;  %s1866_s0 = inlined_call_operand.vmem [shape: f32[2,16,64], index: 0, kind: input, shape index: {}]   ;;  %s1867_s5 = inlined_call_operand.vmem [shape: bf16[1,64,128], index: 5, kind: input, shape index: {}]   ;;  %s1868_s3 = inlined_call_operand.vmem [shape: bf16[3,128,128], index: 3, kind: input, shape index: {}]   ;;  %s1869_s2 = inlined_call_operand.vmem [shape: f32[1,128], index: 2, kind: input, shape index: {}]   ;;  %s1870_s6 = inlined_call_operand.vmem [shape: f32[1,128], index: 6, kind: input, shape index: {}]   ;;  %s1871_s4 = inlined_call_operand.vmem [shape: f32[1,128], index: 4, kind: input, shape index: {}]   ;;  %s1872_s7 = inlined_call_operand.vmem [shape: f32[2,16,128], index: 7, kind: output, shape index: {}]  }
   0x1   :  { %v1464_v0 = vld [vmem:[%s1865_s1 + $0x18] sm:$0xff]   ;;  %v1465_v1 = vld [vmem:[%s1865_s1 + $0x10] sm:$0xff]   ;;  %v1466_v3 = vld [vmem:[%s1865_s1 + $0x8] sm:$0xff]   ;;  %vm40_vm2 = vsmask.f32 7938  ;;  %vm172_vm9 = vcmask 523264  }
   0x2   :  { %1356 = vmatprep.subr.bf16.mxu1 %v1464_v0  ;;  %v1468_v4 = vld [vmem:[%s1865_s1 + $0x58] sm:$0xff]   ;;  %v1563_v5 = vld [vmem:[%s1866_s0] sm:$0xff]  ;;  %v1568_v6 = vld [vmem:[%s1866_s0 + $0x8] sm:$0xff]  ;;  %vm60_vm4 = vsmask.f32 4368  ;;  %vm391_vm10 = vcmask 1042432  }
   0x3   :  { %1357 = vmatpush3.bf16.msra.mxu1 %v1464_v0  ;;  %v1573_v7 = vld [vmem:[%s1866_s0 + $0x10] sm:$0xff]  ;;  %v1467_v8 = vld [vmem:[%s1865_s1] sm:$0xff]   ;;  %1380 = vmatprep.subr.bf16.mxu0 %v1468_v4  ;;  %v1581_v9 = vld [vmem:[%s1866_s0 + $0x18] sm:$0xff]  ;;  %v1294_v12 = vpack.c.bf16 %v1563_v5, %v1563_v5  ;;  %v1295_v13 = vpack.c.bf16 %v1568_v6, %v1568_v6  ;;  %vm234_vm11 = vsmask.f32 3328  ;;  %vm392_vm12 = vcmask 1046532  }
   0x4   :  { %1358 = vmatprep.subr.bf16.mxu1 %v1465_v1  ;;  %vm1585_vm3 = vmand %vm31_vm1, %vm32_vm0  ;;  %v37_v11 = vld [vmem:[#allocation2 + $0xc] sm:$0x1]  ;;  %v1296_v14 = vpack.c.bf16 %v1573_v7, %v1573_v7  ;;  %1381 = vmatpush3.bf16.msra.mxu0 %v1468_v4  ;;  %v45_v18 = vld [vmem:[#allocation2 + $0x14] sm:$0x1]  ;;  %v1297_v19 = vpack.c.bf16 %v1581_v9, %v1581_v9  ;;  %vm235_vm13 = vsmask.f32 7440 }
   0x5   :  { %v35_v15 = vsel %vm1585_vm3, 0, %v34_v2  ;;  %v38_v16 = vsel %vm1585_vm3, 0, %v37_v11  ;;  %vm1601_vm5 = vmand %vm31_vm1, %vm40_vm2  ;;  %v63_v21 = vshrl.u32 %v1294_v12, 16  ;;  %v66_v22 = vshll.u32 %v1294_v12, 16  ;;  %v1471_v28 = vld [vmem:[%s1865_s1 + $0x50] sm:$0xff]   ;;  %v1470_v38 = vld [vmem:[%s1865_s1 + $0x38] sm:$0xff]  }
   0x6   :  { %36 = vst [vmem:[#allocation2] sm:$0x1] %v35_v15  ;;  %39 = vst [vmem:[#allocation2 + $0xc] sm:$0x1] %v38_v16  ;;  %v46_v20 = vsel %vm1601_vm5, 0, %v45_v18  ;;  %v71_v23 = vshrl.u32 %v1295_v13, 16  ;;  %1382 = vmatprep.subr.bf16.mxu0 %v1471_v28 }
   0x7   :  { %1359 = vmatpush3.bf16.msra.mxu1 %v1465_v1  ;;  %47 = vst [vmem:[#allocation2 + $0x14] sm:$0x1] %v46_v20  ;;  %v74_v24 = vshll.u32 %v1295_v13, 16  ;;  %v80_v25 = vshrl.u32 %v1296_v14, 16  ;;  %v83_v26 = vshll.u32 %v1296_v14, 16  ;;  %v88_v27 = vshrl.u32 %v1297_v19, 16  ;;  %vm1614_vm7 = vmor %vm32_vm0, %vm60_vm4 }
   0x8   :  { %1360 = vmatprep.subr.bf16.mxu1 %v1466_v3  ;;  %v65_v29 = vrot.slane %v63_v21, 7  ;;  %v73_v30 = vrot.slane %v71_v23, 7  ;;  %v91_v31 = vshll.u32 %v1297_v19, 16  ;;  %1383 = vmatpush3.bf16.msra.mxu0 %v1471_v28  ;;  %vm1623_vm8 = vmand %vm102_vm6, %vm40_vm2  ;;  %v1474_v44 = vld [vmem:[%s1865_s1 + $0x48] sm:$0xff]   ;;  %v1476_v52 = vld [vmem:[%s1865_s1 + $0x40] sm:$0xff]   ;;  %vm604_vm1 = vcmask 1040384  }
   0x9   :  { %v82_v33 = vrot.slane %v80_v25, 7  ;;  %v90_v34 = vrot.slane %v88_v27, 7  ;;  %1384 = vmatprep.subr.bf16.mxu0 %v1474_v44  ;;  %v42_v53 = vld [vmem:[#allocation2 + $0x8] sm:$0x1]  ;;  %v1473_v62 = vld [vmem:[%s1865_s1 + $0x30] sm:$0xff]   ;;  %vm1661_vm14 = vmor %vm391_vm10, %vm392_vm12  ;;  %vm671_vm4 = vcmask 1043456  }
   0xa   :  { %v68_v35 = vor.u32 %v66_v22, %v65_v29  ;;  %v69_v36 = vrot.slane %v65_v29, 4  ;;  %v76_v37 = vor.u32 %v74_v24, %v73_v30  ;;  %v43_v55 = vsel %vm1601_vm5, 0, %v42_v53  ;;  %v1475_v10 = vld [vmem:[%s1865_s1 + $0x28] sm:$0xff]   ;;  %vm1677_vm15 = vmor %vm234_vm11, %vm235_vm13 }
   0xb   :  { %1361 = vmatpush3.bf16.msra.mxu1 %v1466_v3  ;;  %v85_v39 = vor.u32 %v83_v26, %v82_v33  ;;  %v86_v40 = vrot.slane %v82_v33, 4  ;;  %v93_v41 = vor.u32 %v91_v31, %v90_v34  ;;  %v95_v42 = vrot.slane %v90_v34, 4  ;;  %44 = vst [vmem:[#allocation2 + $0x8] sm:$0x1] %v43_v55  ;;  %vm1784_vm5 = vmand %vm671_vm4, %vm40_vm2 }
   0xc   :  { %1362 = vmatprep.subr.bf16.mxu1 %v1467_v8  ;;  %v77_v45 = vsel %vm1614_vm7, %v69_v36, %v76_v37  ;;  %1385 = vmatpush3.bf16.msra.mxu0 %v1474_v44  ;;  %v78_v56 = vrot.slane %v73_v30, 4  ;;  %v1477_v37 = vld [vmem:[%s1865_s1 + $0x20] sm:$0xff]   ;;  %v1506_v44 = vld [vmem:[%s1868_s3 + $0x88] sm:$0xff]  }
   0xd   :  { %v94_v46 = vsel %vm1614_vm7, %v86_v40, %v93_v41  ;;  %v104_v47 = vld [vmem:[#allocation2] sm:$0xf]  ;;  %108 = vst.msk [vmem:[#allocation2 + $0x4] sm:$0xf] %vm102_vm6, %v77_v45  ;;  %v112_v48 = vld [vmem:[#allocation2 + $0xc] sm:$0xf]  ;;  %1386 = vmatprep.subr.bf16.mxu0 %v1476_v52 }
   0xe   :  { %v105_v49 = vsel %vm1623_vm8, %v68_v35, %v104_v47  ;;  %v113_v50 = vsel %vm1623_vm8, %v85_v39, %v112_v48  ;;  %115 = vst.msk [vmem:[#allocation2 + $0x10] sm:$0xf] %vm102_vm6, %v94_v46  ;;  %v116_v51 = vld [vmem:[#allocation2 + $0x14] sm:$0x1] }
   0xf   :  { %1363 = vmatpush3.bf16.msra.mxu1 %v1467_v8  ;;  %106 = vst [vmem:[#allocation2] sm:$0xf] %v105_v49  ;;  %v117_v54 = vsel %vm1585_vm3, %v95_v42, %v116_v51  ;;  %114 = vst [vmem:[#allocation2 + $0xc] sm:$0xf] %v113_v50 }
  0x10   :  { %1368 = vmatprep.subr.bf16.mxu1 %v1470_v38  ;;  %118 = vst [vmem:[#allocation2 + $0x14] sm:$0x1] %v117_v54  ;;  %1387 = vmatpush3.bf16.msra.mxu0 %v1476_v52 }
  0x12   :  { %v109_v63 = vld [vmem:[#allocation2 + $0x8] sm:$0x1] }
  0x13   :  { %v110_v0 = vsel %vm1585_vm3, %v78_v56, %v109_v63  ;;  %v1478_v63 = vld [vmem:[%s1867_s5 + $0x18] sm:$0xff]   ;;  %vm1713_vm3 = vmand %vm604_vm1, %vm32_vm0 }
  0x14   :  { %v229_v57 = vld [vmem:[#allocation2 + $0x4] sm:$0xf]  ;;  %111 = vst [vmem:[#allocation2 + $0x8] sm:$0x1] %v110_v0  ;;  %v1479_v0 = vld [vmem:[%s1867_s5 + $0x10] sm:$0xff]   ;;  %vm612_vm0 = vmand %vm604_vm1, %vm40_vm2 }
  0x15   :  { %v247_v58 = vshll.u32 %v229_v57, 16  ;;  %v251_v59 = vshrl.u32 %v229_v57, 16  ;;  %v232_v3 = vld [vmem:[#allocation2 + $0x10] sm:$0xf]  ;;  %v396_v14 = vrot.slane %v229_v57, 5 }
  0x16   :  { %v1469_v60 = vld [vmem:[#allocation2] sm:$0xff]   ;;  %v1472_v61 = vld [vmem:[#allocation2 + $0xc] sm:$0xff]   ;;  %v271_v11 = vshll.u32 %v232_v3, 16  ;;  %v275_v12 = vshrl.u32 %v232_v3, 16  ;;  %v403_v17 = vrot.slane %v232_v3, 5 }
  0x17   :  { %1364 = vmatprep.mubr.msk.bf16.mxu1 %vm172_vm9, %v1469_v60  ;;  %v1653_v1 = vrot.slane %v247_v58, 5  ;;  %v253_v2 = vrot.slane %v251_v59, 4  ;;  %v233_v4 = vld [vmem:[#allocation2 + $0x14] sm:$0x1]  ;;  %v383_v8 = vld [vmem:[#allocation2] sm:$0xe] }
  0x18   :  { %1365 = vmatmul.mubr.msk.bf16.vlgmr.msra.gmra.mxu1 %vm172_vm9, %v1472_v61  ;;  %v384_v13 = vld [vmem:[#allocation2 + $0xc] sm:$0xe]  ;;  %v281_v15 = vshll.u32 %v233_v4, 16  ;;  %v228_v18 = vld [vmem:[#allocation2] sm:$0xf]  ;;  %v277_v20 = vrot.slane %v275_v12, 4 }
  0x19   :  { %1369 = vmatpush3.bf16.msra.mxu1 %v1470_v38  ;;  %v1201_v16 = vrot.slane %v384_v13, 9  ;;  %v406_v21 = vrot.slane %v233_v4, 5  ;;  %v238_v22 = vshrl.u32 %v228_v18, 16  ;;  %v231_v23 = vld [vmem:[#allocation2 + $0xc] sm:$0xf]  ;;  %v1200_v24 = vrot.slane %v383_v8, 9 }
  0x1a   :  { %1370 = vmatprep.subr.bf16.mxu1 %v1473_v62  ;;  %v405_v25 = vrot.slane %v403_v17, 4  ;;  %v241_v26 = vshll.u32 %v228_v18, 16  ;;  %v254_v27 = vor.u32 %v253_v2, %v1653_v1  ;;  %v262_v29 = vshrl.u32 %v231_v23, 16  ;;  %v1481_v2 = vld [vmem:[%s1867_s5 + $0x8] sm:$0xff]   ;;  %v1482_v3 = vld [vmem:[%s1868_s3 + $0x30] sm:$0xff]  }
  0x1b   :  { %v240_v28 = vrot.slane %v238_v22, 4  ;;  %v265_v30 = vshll.u32 %v231_v23, 16  ;;  %v273_v31 = vrot.slane %v271_v11, 5  ;;  %v398_v33 = vrot.slane %v396_v14, 4  ;;  %v230_v42 = vld [vmem:[#allocation2 + $0x8] sm:$0x1] }
  0x1c   :  { %v283_v34 = vrot.slane %v281_v15, 5  ;;  %v404_v35 = vsel %vm1661_vm14, %v1201_v16, %v403_v17  ;;  %v243_v36 = vrot.slane %v241_v26, 5  ;;  %v407_v38 = vsel %vm1661_vm14, %v405_v25, %v406_v21  ;;  %v609_v4 = vld [vmem:[#allocation3 + $0xc] sm:$0x1]  ;;  %v1484_v13 = vld [vmem:[%s1868_s3 + $0x28] sm:$0xff]   ;;  %v1485_v17 = vld [vmem:[%s1868_s3 + $0x78] sm:$0xff]  }
  0x1d   :  { %1371 = vmatpush3.bf16.msra.mxu1 %v1473_v62  ;;  %v264_v39 = vrot.slane %v262_v29, 4  ;;  %v267_v40 = vrot.slane %v265_v30, 5  ;;  %v278_v41 = vor.u32 %v277_v20, %v273_v31  ;;  %v397_v43 = vsel %vm1661_vm14, %v1200_v24, %v396_v14  ;;  %v1483_v11 = vld [vmem:[%s1867_s5] sm:$0xff]   ;;  %v606_v14 = vld [vmem:[#allocation3] sm:$0x1]  ;;  %v1489_v22 = vld [vmem:[%s1868_s3 + $0x68] sm:$0xff]  }
  0x1e   :  { %1372 = vmatprep.subr.bf16.mxu1 %v1475_v10  ;;  %v244_v45 = vor.u32 %v243_v36, %v240_v28  ;;  %v255_v46 = vrot.slane %v254_v27, 4  ;;  %v257_v47 = vshll.u32 %v230_v42, 16  ;;  %v399_v48 = vrot.slane %v230_v42, 5  ;;  %v616_v18 = vld [vmem:[#allocation3 + $0x14] sm:$0x1]  ;;  %v1486_v20 = vld [vmem:[%s1868_s3 + $0x20] sm:$0xff]  }
  0x1f   :  { %v268_v49 = vor.u32 %v267_v40, %v264_v39  ;;  %v279_v50 = vrot.slane %v278_v41, 4  ;;  %v1211_v51 = vcombine.low %v404_v35, %v407_v38  ;;  %v610_v12 = vsel %vm1713_vm3, 0, %v609_v4  ;;  %v1490_v23 = vld [vmem:[%s1868_s3 + $0x10] sm:$0xff]   ;;  %v1491_v24 = vld [vmem:[%s1868_s3 + $0x60] sm:$0xff]   ;;  %v1492_v25 = vld [vmem:[%s1868_s3 + $0x8] sm:$0xff]  }
  0x20   :  { %v245_v52 = vrot.slane %v244_v45, 4  ;;  %v259_v53 = vrot.slane %v257_v47, 5  ;;  %v400_v54 = vsel %vm1661_vm14, %v398_v33, %v399_v48  ;;  %611 = vst [vmem:[#allocation3 + $0xc] sm:$0x1] %v610_v12  ;;  %v607_v15 = vsel %vm1713_vm3, 0, %v606_v14  ;;  %v1493_v26 = vld [vmem:[%s1868_s3 + $0x58] sm:$0xff]  }
  0x21   :  { %1373 = vmatpush3.bf16.msra.mxu1 %v1475_v10  ;;  %v269_v55 = vrot.slane %v268_v49, 4  ;;  %v284_v56 = vsel %vm1677_vm15, %v279_v50, %v283_v34  ;;  %v1210_v57 = vcombine.low %v397_v43, %v400_v54  ;;  %v48_v16 = vpack.c.bf16 %v1568_v6, %v1563_v5  ;;  %608 = vst [vmem:[#allocation3] sm:$0x1] %v607_v15  ;;  %v613_v5 = vld [vmem:[#allocation3 + $0x8] sm:$0x1]  ;;  %v1495_v28 = vld [vmem:[%s1868_s3 + $0x50] sm:$0xff]  }
  0x22   :  { %1374 = vmatprep.subr.bf16.mxu1 %v1477_v37  ;;  %v250_v58 = vsel %vm1677_vm15, %v245_v52, %v1653_v1  ;;  %v260_v59 = vsel %vm1677_vm15, %v255_v46, %v259_v53  ;;  %v1480_v1 = vld [vmem:[%s1868_s3 + $0x38] sm:$0xff]   ;;  %v49_v10 = vpack.c.bf16 %v1581_v9, %v1573_v7  ;;  %v617_v21 = vsel %vm612_vm0, 0, %v616_v18  ;;  %v1487_v7 = vld [vmem:[%s1868_s3 + $0x70] sm:$0xff]   ;;  %v1494_v27 = vld [vmem:[%s1868_s3] sm:$0xff]  }
  0x23   :  { %v274_v60 = vsel %vm1677_vm15, %v269_v55, %v273_v31  ;;  %1388 = vmatprep.mubr.msk.bf16.mxu0 %vm172_vm9, %v1210_v57  ;;  %v1192_v61 = vcombine.low %v250_v58, %v260_v59  ;;  %1404 = vmatprep.subr.bf16.mxu0 %v1480_v1  ;;  %618 = vst [vmem:[#allocation3 + $0x14] sm:$0x1] %v617_v21  ;;  %v614_v6 = vsel %vm612_vm0, 0, %v613_v5  ;;  %v1488_v9 = vld [vmem:[%s1868_s3 + $0x18] sm:$0xff]   ;;  %v1499_v30 = vld [vmem:[%s1868_s3 + $0x48] sm:$0xff]   ;;  %v1501_v31 = vld [vmem:[%s1868_s3 + $0x40] sm:$0xff]  }
  0x24   :  { %v1193_v62 = vcombine.low %v274_v60, %v284_v56  ;;  %1389 = vmatmul.mubr.msk.bf16.vlgmr.msra.gmra.mxu0 %vm172_vm9, %v1211_v51  ;;  %615 = vst [vmem:[#allocation3 + $0x8] sm:$0x1] %v614_v6  ;;  %v1771_v29 = vld [vmem:[%s1868_s3 + $0xb8] sm:$0xff]   ;;  %v1175_v36 = vld [vmem:[%s1869_s2] ss:$0 sm:$0xff] }
  0x25   :  { %1375 = vmatpush3.bf16.msra.mxu1 %v1477_v37  ;;  %1376 = vmatprep.mubr.msk.bf16.mxu1 %vm172_vm9, %v1192_v61 }
  0x26   :  { %1392 = vmatprep.subr.bf16.mxu1 %v1478_v63  ;;  %1405 = vmatpush3.bf16.msra.mxu0 %v1480_v1 }
  0x27   :  { %1406 = vmatprep.subr.bf16.mxu0 %v1482_v3  ;;  %v680_v12 = vld [vmem:[#allocation3 + $0xc] sm:$0xf] }
  0x28   :  { %1377 = vmatmul.mubr.msk.bf16.vlgmr.msra.gmra.mxu1 %vm172_vm9, %v1193_v62  ;;  %v673_v18 = vld [vmem:[#allocation3] sm:$0xf] }
  0x29   :  { %1393 = vmatpush3.bf16.msra.mxu1 %v1478_v63  ;;  %1400 = vmatprep.mubr.msk.bf16.mxu1 %vm172_vm9, %v48_v16 }
  0x2a   :  { %1394 = vmatprep.subr.bf16.mxu1 %v1479_v0  ;;  %1407 = vmatpush3.bf16.msra.mxu0 %v1482_v3 }
  0x2b   :  { %1408 = vmatprep.subr.bf16.mxu0 %v1484_v13 }
  0x2d   :  { %1395 = vmatpush3.bf16.msra.mxu1 %v1479_v0 }
  0x2e   :  { %1396 = vmatprep.subr.bf16.mxu1 %v1481_v2  ;;  %1409 = vmatpush3.bf16.msra.mxu0 %v1484_v13 }
  0x2f   :  { %1410 = vmatprep.subr.bf16.mxu0 %v1486_v20 }
  0x31   :  { %1397 = vmatpush3.bf16.msra.mxu1 %v1481_v2 }
  0x32   :  { %1398 = vmatprep.subr.bf16.mxu1 %v1483_v11  ;;  %1411 = vmatpush3.bf16.msra.mxu0 %v1486_v20 }
  0x33   :  { %1412 = vmatprep.subr.bf16.mxu0 %v1488_v9 }
  0x35   :  { %1399 = vmatpush3.bf16.msra.mxu1 %v1483_v11 }
  0x36   :  { %1424 = vmatprep.subr.bf16.mxu1 %v1485_v17  ;;  %1413 = vmatpush3.bf16.msra.mxu0 %v1488_v9 }
  0x37   :  { %1414 = vmatprep.subr.bf16.mxu0 %v1490_v23 }
  0x38   :  { %1401 = vmatmul.mubr.msk.bf16.vlgmr.msra.gmra.mxu1 %vm172_vm9, %v49_v10 }
  0x39   :  { %1425 = vmatpush3.bf16.msra.mxu1 %v1485_v17 }
  0x3a   :  { %1426 = vmatprep.subr.bf16.mxu1 %v1487_v7  ;;  %1415 = vmatpush3.bf16.msra.mxu0 %v1490_v23 }
  0x3b   :  { %1416 = vmatprep.subr.bf16.mxu0 %v1492_v25 }
  0x3d   :  { %1427 = vmatpush3.bf16.msra.mxu1 %v1487_v7  ;;  %v684_v7 = vld [vmem:[#allocation3 + $0x14] sm:$0x1] }
  0x3e   :  { %1428 = vmatprep.subr.bf16.mxu1 %v1489_v22  ;;  %1417 = vmatpush3.bf16.msra.mxu0 %v1492_v25 }
  0x3f   :  { %1418 = vmatprep.subr.bf16.mxu0 %v1494_v27 }
  0x41   :  { %1429 = vmatpush3.bf16.msra.mxu1 %v1489_v22 }
  0x42   :  { %1430 = vmatprep.subr.bf16.mxu1 %v1491_v24  ;;  %1419 = vmatpush3.bf16.msra.mxu0 %v1494_v27 }
  0x43   :  { %1444 = vmatprep.subr.bf16.mxu0 %v1771_v29 }
  0x45   :  { %1431 = vmatpush3.bf16.msra.mxu1 %v1491_v24 }
  0x46   :  { %1432 = vmatprep.subr.bf16.mxu1 %v1493_v26 }
  0x49   :  { %1433 = vmatpush3.bf16.msra.mxu1 %v1493_v26 }
  0x4a   :  { %1434 = vmatprep.subr.bf16.mxu1 %v1495_v28 }
  0x4d   :  { %1435 = vmatpush3.bf16.msra.mxu1 %v1495_v28 }
  0x4e   :  { %1436 = vmatprep.subr.bf16.mxu1 %v1499_v30 }
  0x51   :  { %1437 = vmatpush3.bf16.msra.mxu1 %v1499_v30 }
  0x52   :  { %1438 = vmatprep.subr.bf16.mxu1 %v1501_v31 }
  0x55   :  { %1439 = vmatpush3.bf16.msra.mxu1 %v1501_v31  ;;  %v677_v31 = vld [vmem:[#allocation3 + $0x8] sm:$0x1] }
  0xd8   :  { %v1366_v33 = vpop.f32.mrf.mxu1 }
  0xd9   :  { %v222_v39 = vadd.f32 %v1366_v33, %v1175_v36 }
  0xda   :  { %v213_v34 = vpop.f32.mrf.mxu1 }
  0xdb   :  { %v214_v41 = vadd.f32 %v1175_v36, %v213_v34 }
  0xdc   :  { %v1367_v35 = vpop.f32.mrf.mxu1 }
  0xdd   :  { %v225_v46 = vadd.f32 %v1367_v35, %v1175_v36 }
  0xde   :  { %v216_v37 = vpop.f32.mrf.mxu1 }
  0xdf   :  { %v217_v50 = vadd.f32 %v1175_v36, %v216_v37 }
  0xe4   :  { %v1390_v38 = vpop.f32.mrf.mxu0 }
  0xe6   :  { %v487_v42 = vpop.f32.mrf.mxu0 }
  0xe8   :  { %v1378_v40 = vpop.f32.mrf.mxu1  ;;  %v1391_v52 = vpop.f32.mrf.mxu0 }
  0xe9   :  { %v381_v43 = vadd.f32 %v1378_v40, %v222_v39 }
  0xea   :  { %v364_v45 = vpop.f32.mrf.mxu1  ;;  %v490_v62 = vpop.f32.mrf.mxu0 }
  0xeb   :  { %v504_v47 = vadd.f32 %v1390_v38, %v381_v43  ;;  %v379_v48 = vadd.f32 %v364_v45, %v214_v41 }
  0xec   :  { %v1379_v49 = vpop.f32.mrf.mxu1 }
  0xed   :  { %v508_v51 = vmax.f32 %v504_v47, 0.0  ;;  %v502_v53 = vadd.f32 %v487_v42, %v379_v48  ;;  %v382_v54 = vadd.f32 %v1379_v49, %v225_v46 }
  0xee   :  { %v367_v55 = vpop.f32.mrf.mxu1 }
  0xef   :  { %v1300_v56 = vpack.c.bf16 %v508_v51, %v508_v51  ;;  %v506_v57 = vmax.f32 %v502_v53, 0.0  ;;  %v505_v58 = vadd.f32 %v1391_v52, %v382_v54  ;;  %v380_v59 = vadd.f32 %v367_v55, %v217_v50  ;;  %v1500_v51 = vld [vmem:[%s1868_s3 + $0xb0] sm:$0xff]  }
  0xf1   :  { %v649_v60 = vshrl.u32 %v1300_v56, 16  ;;  %v1298_v61 = vpack.c.bf16 %v506_v57, %v506_v57  ;;  %v509_v63 = vmax.f32 %v505_v58, 0.0  ;;  %v503_v0 = vadd.f32 %v490_v62, %v380_v59 }
  0xf2   :  { %v652_v2 = vshll.u32 %v1300_v56, 16 }
  0xf3   :  { %v651_v1 = vrot.slane %v649_v60, 7  ;;  %v632_v3 = vshrl.u32 %v1298_v61, 16  ;;  %v1301_v4 = vpack.c.bf16 %v509_v63, %v509_v63  ;;  %v507_v13 = vmax.f32 %v503_v0, 0.0 }
  0xf4   :  { %v635_v16 = vshll.u32 %v1298_v61, 16 }
  0xf5   :  { %v654_v14 = vor.u32 %v652_v2, %v651_v1  ;;  %v634_v15 = vrot.slane %v632_v3, 7  ;;  %v657_v17 = vshrl.u32 %v1301_v4, 16  ;;  %v1299_v10 = vpack.c.bf16 %v507_v13, %v507_v13 }
  0xf6   :  { %v660_v6 = vshll.u32 %v1301_v4, 16  ;;  %v655_v22 = vrot.slane %v651_v1, 4 }
  0xf7   :  { %v681_v20 = vsel %vm1784_vm5, %v654_v14, %v680_v12  ;;  %v637_v21 = vor.u32 %v635_v16, %v634_v15  ;;  %v659_v5 = vrot.slane %v657_v17, 7  ;;  %v640_v9 = vshrl.u32 %v1299_v10, 16  ;;  %v1502_v16 = vld [vmem:[%s1868_s3 + $0xa8] sm:$0xff]  }
  0xf8   :  { %682 = vst [vmem:[#allocation3 + $0xc] sm:$0xf] %v681_v20  ;;  %v643_v27 = vshll.u32 %v1299_v10, 16  ;;  %v638_v33 = vrot.slane %v634_v15, 4 }
  0xf9   :  { %v674_v23 = vsel %vm1784_vm5, %v637_v21, %v673_v18  ;;  %v662_v24 = vor.u32 %v660_v6, %v659_v5  ;;  %v664_v25 = vrot.slane %v659_v5, 4  ;;  %v642_v26 = vrot.slane %v640_v9, 7 }
  0xfa   :  { %675 = vst [vmem:[#allocation3] sm:$0xf] %v674_v23  ;;  %v1503_v23 = vld [vmem:[%s1868_s3 + $0xa0] sm:$0xff]  }
  0xfb   :  { %v663_v28 = vsel %vm1614_vm7, %v655_v22, %v662_v24  ;;  %v685_v30 = vsel %vm1713_vm3, %v664_v25, %v684_v7  ;;  %v645_v34 = vor.u32 %v643_v27, %v642_v26  ;;  %v647_v35 = vrot.slane %v642_v26, 4  ;;  %v1504_v27 = vld [vmem:[%s1868_s3 + $0x98] sm:$0xff]  }
  0xfc   :  { %683 = vst [vmem:[#allocation3 + $0x10] sm:$0xf] %v663_v28  ;;  %686 = vst [vmem:[#allocation3 + $0x14] sm:$0x1] %v685_v30  ;;  %v1505_v28 = vld [vmem:[%s1868_s3 + $0x90] sm:$0xff]  }
  0xfd   :  { %v646_v36 = vsel %vm1614_vm7, %v638_v33, %v645_v34  ;;  %v678_v37 = vsel %vm1713_vm3, %v647_v35, %v677_v31  ;;  %v1507_v31 = vld [vmem:[%s1868_s3 + $0x80] sm:$0xff]  }
  0xfe   :  { %676 = vst [vmem:[#allocation3 + $0x4] sm:$0xf] %v646_v36  ;;  %679 = vst [vmem:[#allocation3 + $0x8] sm:$0x1] %v678_v37 }
  0xff   :  { %v834_v38 = vld [vmem:[#allocation3 + $0xc] sm:$0xf] }
 0x100   :  { %v862_v39 = vshrl.u32 %v834_v38, 16  ;;  %v865_v40 = vshll.u32 %v834_v38, 16  ;;  %v1012_v34 = vld [vmem:[#allocation3 + $0xc] sm:$0xe] }
 0x101   :  { %v831_v41 = vld [vmem:[#allocation3] sm:$0xf]  ;;  %v1267_v36 = vrot.slane %v1012_v34, 9 }
 0x102   :  { %v1011_v42 = vld [vmem:[#allocation3] sm:$0xe]  ;;  %v838_v43 = vshrl.u32 %v831_v41, 16  ;;  %v841_v45 = vshll.u32 %v831_v41, 16  ;;  %v864_v47 = vrot.slane %v862_v39, 4  ;;  %v867_v48 = vrot.slane %v865_v40, 5  ;;  %v1402_v40 = vpop.f32.mrf.mxu1 }
 0x103   :  { %v1800_v46 = vld [vmem:[#allocation3 + $0x10] sm:$0xf]  ;;  %v1266_v52 = vrot.slane %v1011_v42, 9  ;;  %v1807_v53 = vld [vmem:[#allocation3 + $0x14] sm:$0x1] }
 0x104   :  { %v840_v49 = vrot.slane %v838_v43, 4  ;;  %v843_v50 = vrot.slane %v841_v45, 5  ;;  %v871_v32 = vshll.u32 %v1800_v46, 16  ;;  %v875_v8 = vshrl.u32 %v1800_v46, 16  ;;  %v1498_v57 = vld [vmem:[#allocation3 + $0xc] sm:$0xff]   ;;  %v589_v41 = vpop.f32.mrf.mxu1 }
 0x105   :  { %v1496_v54 = vld [vmem:[#allocation3] sm:$0xff]   ;;  %v833_v58 = vld [vmem:[#allocation3 + $0x8] sm:$0x1]  ;;  %v868_v0 = vor.u32 %v867_v48, %v864_v47  ;;  %v881_v2 = vshll.u32 %v1807_v53, 16  ;;  %v1028_v30 = vrot.slane %v1800_v46, 5  ;;  %v1031_v35 = vrot.slane %v1807_v53, 5 }
 0x106   :  { %v832_v55 = vld [vmem:[#allocation3 + $0x4] sm:$0xf]  ;;  %v873_v56 = vrot.slane %v871_v32, 5  ;;  %v844_v60 = vor.u32 %v843_v50, %v840_v49  ;;  %1420 = vmatprep.mubr.bf16.mxu0 %v1496_v54  ;;  %v1024_v63 = vrot.slane %v833_v58, 5  ;;  %v877_v1 = vrot.slane %v875_v8, 4  ;;  %v1403_v42 = vpop.f32.mrf.mxu1 }
 0x107   :  { %v1021_v59 = vrot.slane %v832_v55, 5  ;;  %v847_v61 = vshll.u32 %v832_v55, 16  ;;  %v851_v62 = vshrl.u32 %v832_v55, 16  ;;  %1421 = vmatmul.mubr.bf16.vlgmr.msra.gmra.mxu0 %v1498_v57  ;;  %v857_v12 = vshll.u32 %v833_v58, 16  ;;  %v1218_v43 = vld [vmem:[%s1870_s6] ss:$0 sm:$0xff] }
 0x108   :  { %1445 = vmatpush3.bf16.msra.mxu0 %v1771_v29  ;;  %v878_v13 = vor.u32 %v877_v1, %v873_v56  ;;  %v845_v17 = vrot.slane %v844_v60, 4  ;;  %v869_v20 = vrot.slane %v868_v0, 4  ;;  %v883_v5 = vrot.slane %v881_v2, 5  ;;  %v592_v46 = vpop.f32.mrf.mxu1  ;;  %v1229_v48 = vld [vmem:[%s1871_s4] ss:$0 sm:$0xff] }
 0x109   :  { %v1023_v3 = vrot.slane %v1021_v59, 4  ;;  %v849_v4 = vrot.slane %v847_v61, 5  ;;  %v853_v11 = vrot.slane %v851_v62, 4  ;;  %1446 = vmatprep.subr.bf16.mxu0 %v1500_v51  ;;  %v1022_v14 = vsel %vm1661_vm14, %v1266_v52, %v1021_v59 }
 0x10a   :  { %v879_v21 = vrot.slane %v878_v13, 4  ;;  %v859_v29 = vrot.slane %v857_v12, 5  ;;  %v874_v25 = vsel %vm1677_vm15, %v869_v20, %v873_v56  ;;  %v1030_v33 = vrot.slane %v1028_v30, 4 }
 0x10b   :  { %v1025_v15 = vsel %vm1661_vm14, %v1023_v3, %v1024_v63  ;;  %v854_v18 = vor.u32 %v853_v11, %v849_v4  ;;  %v850_v9 = vsel %vm1677_vm15, %v845_v17, %v849_v4  ;;  %v1029_v38 = vsel %vm1661_vm14, %v1267_v36, %v1028_v30 }
 0x10c   :  { %v1284_v10 = vcombine.low %v1022_v14, %v1025_v15  ;;  %1447 = vmatpush3.bf16.msra.mxu0 %v1500_v51  ;;  %v884_v7 = vsel %vm1677_vm15, %v879_v21, %v883_v5  ;;  %v1032_v37 = vsel %vm1661_vm14, %v1030_v33, %v1031_v35  ;;  %v598_v47 = vadd.f32 %v1402_v40, %v1218_v43 }
 0x10d   :  { %v855_v6 = vrot.slane %v854_v18, 4  ;;  %1448 = vmatprep.subr.bf16.mxu0 %v1502_v16  ;;  %v1257_v26 = vcombine.low %v874_v25, %v884_v7  ;;  %v1285_v39 = vcombine.low %v1029_v38, %v1032_v37  ;;  %v590_v19 = vadd.f32 %v1218_v43, %v589_v41 }
 0x10e   :  { %1460 = vmatprep.mubr.bf16.mxu0 %v1284_v10  ;;  %v696_v32 = vadd.f32 %v1229_v48, %v598_v47  ;;  %v601_v52 = vadd.f32 %v1403_v42, %v1218_v43  ;;  %v593_v54 = vadd.f32 %v1218_v43, %v592_v46 }
 0x10f   :  { %v860_v22 = vsel %vm1677_vm15, %v855_v6, %v859_v29  ;;  %v694_v53 = vadd.f32 %v1229_v48, %v590_v19 }
 0x110   :  { %v1256_v24 = vcombine.low %v850_v9, %v860_v22  ;;  %1449 = vmatpush3.bf16.msra.mxu0 %v1502_v16  ;;  %v697_v59 = vadd.f32 %v1229_v48, %v601_v52  ;;  %v695_v63 = vadd.f32 %v1229_v48, %v593_v54 }
 0x111   :  { %1450 = vmatprep.subr.bf16.mxu0 %v1503_v23 }
 0x112   :  { %1440 = vmatprep.mubr.bf16.mxu1 %v1256_v24 }
 0x113   :  { %1441 = vmatmul.mubr.bf16.vlgmr.msra.gmra.mxu1 %v1257_v26 }
 0x114   :  { %1451 = vmatpush3.bf16.msra.mxu0 %v1503_v23 }
 0x115   :  { %1452 = vmatprep.subr.bf16.mxu0 %v1504_v27 }
 0x118   :  { %1453 = vmatpush3.bf16.msra.mxu0 %v1504_v27 }
 0x119   :  { %1454 = vmatprep.subr.bf16.mxu0 %v1505_v28 }
 0x11c   :  { %1455 = vmatpush3.bf16.msra.mxu0 %v1505_v28 }
 0x11d   :  { %1456 = vmatprep.subr.bf16.mxu0 %v1506_v44 }
 0x120   :  { %1457 = vmatpush3.bf16.msra.mxu0 %v1506_v44 }
 0x121   :  { %1458 = vmatprep.subr.bf16.mxu0 %v1507_v31 }
 0x124   :  { %1459 = vmatpush3.bf16.msra.mxu0 %v1507_v31 }
 0x127   :  { %1461 = vmatmul.mubr.bf16.vlgmr.msra.gmra.mxu0 %v1285_v39 }
 0x1c7   :  { %v1422_v45 = vpop.f32.mrf.mxu0 }
 0x1c8   :  { %v829_v55 = vadd.f32 %v1422_v45, %v696_v32 }
 0x1c9   :  { %v812_v49 = vpop.f32.mrf.mxu0 }
 0x1ca   :  { %v827_v58 = vadd.f32 %v812_v49, %v694_v53 }
 0x1cb   :  { %v1423_v8 = vpop.f32.mrf.mxu0 }
 0x1cc   :  { %v830_v62 = vadd.f32 %v1423_v8, %v697_v59 }
 0x1cd   :  { %v815_v56 = vpop.f32.mrf.mxu0 }
 0x1ce   :  { %v828_v4 = vadd.f32 %v815_v56, %v695_v63 }
 0x1d3   :  { %v1442_v50 = vpop.f32.mrf.mxu1 }
 0x1d4   :  { %v1009_v60 = vadd.f32 %v1442_v50, %v829_v55 }
 0x1d5   :  { %v992_v51 = vpop.f32.mrf.mxu1 }
 0x1d6   :  { %v1007_v0 = vadd.f32 %v992_v51, %v827_v58 }
 0x1d7   :  { %v1443_v57 = vpop.f32.mrf.mxu1 }
 0x1d8   :  { %v1010_v11 = vadd.f32 %v1443_v57, %v830_v62 }
 0x1d9   :  { %v995_v2 = vpop.f32.mrf.mxu1 }
 0x1da   :  { %v1008_v15 = vadd.f32 %v995_v2, %v828_v4 }
 0x1e7   :  { %v1462_v61 = vpop.f32.mrf.mxu0 }
 0x1e8   :  { %v1157_v1 = vadd.f32 %v1462_v61, %v1009_v60 }
 0x1e9   :  { %v1140_v3 = vpop.f32.mrf.mxu0 }
 0x1ea   :  { %v1161_v12 = vmax.f32 %v1157_v1, 0.0  ;;  %v1155_v13 = vadd.f32 %v1140_v3, %v1007_v0 }
 0x1eb   :  { %v1463_v14 = vpop.f32.mrf.mxu0 }
 0x1ec   :  { %1165 = vst [vmem:[%s1872_s7 + $0x10] sm:$0xff] %v1161_v12  ;;  %v1159_v16 = vmax.f32 %v1155_v13, 0.0  ;;  %v1158_v17 = vadd.f32 %v1463_v14, %v1010_v11 }
 0x1ed   :  { %v1143_v18 = vpop.f32.mrf.mxu0 }
 0x1ee   :  { %1163 = vst [vmem:[%s1872_s7] sm:$0xff] %v1159_v16  ;;  %v1162_v10 = vmax.f32 %v1158_v17, 0.0  ;;  %v1156_v20 = vadd.f32 %v1143_v18, %v1008_v15 }
 0x1f0   :  { %1166 = vst [vmem:[%s1872_s7 + $0x18] sm:$0xff] %v1162_v10  ;;  %v1160_v21 = vmax.f32 %v1156_v20, 0.0 }
 0x1f2   :  { %1164 = vst [vmem:[%s1872_s7 + $0x8] sm:$0xff] %v1160_v21 }

</bundles_post_ra>
